<compile_context>
chip_gen: v6e
topology: v6e:2x2x1
jax: 0.10.0
libtpu: 0.0.40
codegen_flags: <defaults>
</compile_context>

<pallas_src>
import functools

import jax
import jax.numpy as jnp
from jax import lax
from jax.experimental import pallas as pl
from jax.experimental.pallas import tpu as pltpu

STATE_DIM = 3


def _permutation_kernel(x_ref, o_ref, *, perm):
    x = x_ref[...]                                        # (TR, L)
    n = len(perm)
    L = x.shape[-1]

    # Lane-slot id on a single (1, L) row; broadcast inside the selects.
    # NOTE: block-local lane index is only correct because every block spans
    # the full L (never tile L without offsetting this iota).
    slot = lax.broadcasted_iota(jnp.int32, (1, L), 1) % n

    # shifted[j][l] == x[l + perm[j] - j] on every lane with l % n == j.
    shifted = []
    for j in range(n):
        s = (j - perm[j]) % L                             # non-negative static shift
        shifted.append(x if s == 0 else pltpu.roll(x, shift=s, axis=1))

    out = shifted[n - 1]
    for j in range(n - 2, -1, -1):
        out = jnp.where(slot == j, shifted[j], out)
    o_ref[...] = out


def _vmem_capacity_bytes():
    try:
        return int(pltpu.get_tpu_info().vmem_capacity_bytes)
    except Exception:
        return 64 << 20                                   # conservative (v7x) fallback


def _pick_row_tile(rows, L, itemsize, cap_bytes):
    """Dtype-aware row tile: multiple of the sublane packing factor, one
    (TR, L) block <= cap_bytes, and >=2 grid steps whenever rows allow."""
    pack = max(8, 32 // itemsize)                         # 8 f32 / 16 bf16 / 32 int8
    if rows <= pack:
        return rows                                       # full-dim block (always legal)
    row_bytes = L * itemsize
    tr = max(pack, (cap_bytes // row_bytes) // pack * pack)
    if tr >= rows:
        # Shrink so the grid has at least 2 steps (v7x megacore sharding).
        half = (rows + 1) // 2
        tr = max(pack, (half + pack - 1) // pack * pack)
    return tr


def permutation_layer(x, perm):
    """x: (B, S, L) with L % STATE_DIM == 0; perm: static tuple of ints."""
    B, S, L = x.shape
    n = len(perm)
    assert L % n == 0, "L must be divisible by STATE_DIM"

    rows = B * S
    x2 = x.reshape(rows, L)                               # minor dim untouched -> free reshape

    vmem_cap = _vmem_capacity_bytes()
    # Pure HBM streaming: big tiles amortise the ~0.35us/step overhead while
    # keeping 2-deep in+out buffering well inside per-core VMEM.
    block_cap = min(8 << 20, (vmem_cap * 3 // 4) // 4)
    tr = _pick_row_tile(rows, L, x2.dtype.itemsize, block_cap)
    grid = (pl.cdiv(rows, tr),)

    block_bytes = tr * L * x2.dtype.itemsize
    vmem_limit = int(min(vmem_cap, max(16 << 20, 5 * block_bytes)))

    kernel = functools.partial(
        _permutation_kernel, perm=tuple(int(p) for p in perm))

    out2 = pl.pallas_call(
        kernel,
        out_shape=jax.ShapeDtypeStruct((rows, L), x2.dtype),
        grid_spec=pltpu.PrefetchScalarGridSpec(
            num_scalar_prefetch=0,
            grid=grid,
            in_specs=[pl.BlockSpec((tr, L), lambda i: (i, 0))],
            out_specs=pl.BlockSpec((tr, L), lambda i: (i, 0)),
        ),
        compiler_params=pltpu.CompilerParams(
            dimension_semantics=("parallel",),
            vmem_limit_bytes=vmem_limit),
    )(x2)
    return out2.reshape(B, S, L)


def reference_forward(x, perm):
    """Pure-JAX reference matching the PyTorch module."""
    B, S, L = x.shape
    xr = x.reshape(B, S, -1, STATE_DIM)
    xp = xr[:, :, :, jnp.asarray(perm)]
    return xp.reshape(B, S, L)


if __name__ == "__main__":
    key = jax.random.PRNGKey(0)
    kp, kx = jax.random.split(key)

    # PermutationLayer.__init__: a fixed random permutation of STATE_DIM
    # (torch.randperm equivalent, made deterministic via PRNGKey(0)).
    perm = tuple(int(v) for v in jax.random.permutation(kp, STATE_DIM))

    # Small shapes consistent with forward(): (B, S, L), L % STATE_DIM == 0.
    # L = 3 * 128 keeps the minor dim lane-dense (multiple of 128).
    B, S, L = 2, 8, 384
    x = jax.random.normal(kx, (B, S, L), jnp.float32)

    out = permutation_layer(x, perm)
    out = jax.block_until_ready(out)

    ref = reference_forward(x, perm)
    assert out.shape == (B, S, L)
    assert jnp.array_equal(out, ref), \
        f"max abs err {jnp.max(jnp.abs(out - ref))}"

    print("KERNEL_OK")
</pallas_src>

<mosaic_0001>
module attributes {stable_mosaic.version = 11 : i64} {
  func.func @_permutation_kernel(%arg0: i32, %arg1: memref<8x384xf32, #tpu.memory_space<vmem>>, %arg2: memref<8x384xf32, #tpu.memory_space<vmem>>) attributes {dimension_semantics = [#tpu.dimension_semantics<parallel>], iteration_bounds = array<i64: 2>, scalar_prefetch = 0 : i64, scratch_operands = 0 : i64, tpu.core_type = #tpu.core_type<tc>, window_params = [{transform_indices = @transform_0, window_bounds = array<i64: 8, 384>}, {transform_indices = @transform_1, window_bounds = array<i64: 8, 384>}]} {
    %c0 = arith.constant 0 : index
    %c0_0 = arith.constant 0 : index
    %0 = vector.load %arg1[%c0, %c0_0] : memref<8x384xf32, #tpu.memory_space<vmem>>, vector<8x384xf32>
    %1 = tpu.iota {dimensions = array<i32: 1>} : vector<1x384xi32>
    %c3_i32 = arith.constant 3 : i32
    %c0_i32 = arith.constant 0 : i32
    %2 = arith.cmpi eq, %c3_i32, %c0_i32 : i32
    %c1_i32 = arith.constant 1 : i32
    %3 = arith.select %2, %c1_i32, %c3_i32 : i32
    %4 = vector.broadcast %3 : i32 to vector<1x384xi32>
    %5 = arith.remsi %1, %4 : vector<1x384xi32>
    %c0_i32_1 = arith.constant 0 : i32
    %6 = vector.broadcast %c0_i32_1 : i32 to vector<1x384xi32>
    %7 = arith.cmpi ne, %5, %6 : vector<1x384xi32>
    %c0_i32_2 = arith.constant 0 : i32
    %8 = vector.broadcast %c0_i32_2 : i32 to vector<1x384xi32>
    %9 = arith.cmpi slt, %5, %8 : vector<1x384xi32>
    %c0_i32_3 = arith.constant 0 : i32
    %10 = arith.cmpi slt, %3, %c0_i32_3 : i32
    %11 = vector.broadcast %10 : i1 to vector<1x384xi1>
    %12 = vector.broadcast %11 : vector<1x384xi1> to vector<1x384xi1>
    %13 = arith.xori %9, %12 : vector<1x384xi1>
    %14 = arith.andi %13, %7 : vector<1x384xi1>
    %15 = vector.broadcast %3 : i32 to vector<1x384xi32>
    %16 = arith.addi %5, %15 : vector<1x384xi32>
    %17 = arith.select %14, %16, %5 : vector<1x384xi1>, vector<1x384xi32>
    %c383_i32 = arith.constant 383 : i32
    %18 = tpu.dynamic_rotate %0 by %c383_i32 dim 1 : vector<8x384xf32>, i32 -> vector<8x384xf32>
    %c1_i32_4 = arith.constant 1 : i32
    %19 = tpu.dynamic_rotate %0 by %c1_i32_4 dim 1 : vector<8x384xf32>, i32 -> vector<8x384xf32>
    %c1_i32_5 = arith.constant 1 : i32
    %20 = vector.broadcast %c1_i32_5 : i32 to vector<1x384xi32>
    %21 = arith.cmpi eq, %17, %20 : vector<1x384xi32>
    %22 = vector.shape_cast %21 : vector<1x384xi1> to vector<1x384xi1>
    %23 = vector.broadcast %22 : vector<1x384xi1> to vector<8x384xi1>
    %24 = arith.select %23, %18, %19 : vector<8x384xi1>, vector<8x384xf32>
    %c0_i32_6 = arith.constant 0 : i32
    %25 = vector.broadcast %c0_i32_6 : i32 to vector<1x384xi32>
    %26 = arith.cmpi eq, %17, %25 : vector<1x384xi32>
    %27 = vector.shape_cast %26 : vector<1x384xi1> to vector<1x384xi1>
    %28 = vector.broadcast %27 : vector<1x384xi1> to vector<8x384xi1>
    %29 = arith.select %28, %0, %24 : vector<8x384xi1>, vector<8x384xf32>
    %c0_7 = arith.constant 0 : index
    %c0_8 = arith.constant 0 : index
    %30 = vector.load %arg2[%c0_7, %c0_8] : memref<8x384xf32, #tpu.memory_space<vmem>>, vector<8x384xf32>
    tpu.vector_store %arg2[%c0_7, %c0_8], %29 {strides = array<i32>} : memref<8x384xf32, #tpu.memory_space<vmem>>, vector<8x384xf32>,
    return
  }
  func.func @transform_0(%arg0: i32) -> (i32, i32) {
    %c0_i32 = arith.constant 0 : i32
    %c0_i32_0 = arith.constant 0 : i32
    return %arg0, %c0_i32 : i32, i32
  }
  func.func @transform_1(%arg0: i32) -> (i32, i32) {
    %c0_i32 = arith.constant 0 : i32
    %c0_i32_0 = arith.constant 0 : i32
    return %arg0, %c0_i32 : i32, i32
  }
}

</mosaic_0001>

<bundles_post_ra>
// kernel: tpu_custom_call.1
= control target key start
LH: loop header
LB: loop body
LE: loop exit
PB: predicated region body
PF: predicated region fallthrough
CT: control target
= control target key end

     0   :  { %6 = vsyncpa [#allocation3], 0  ;;  %s671_s0 = inlined_call_operand.hbm [shape: f32[16,384], index: 0, kind: input, shape index: {}]   ;;  %s672_s1 = inlined_call_operand.hbm [shape: f32[16,384], index: 1, kind: output, shape index: {}]  }
   0x1   :  { %8 = vsyncpa [#allocation3 + $0x1], 0 }
   0x2   :  { %9 = vsyncpa [#allocation4], 0 }
   0x3   :  { %11 = vsyncpa [#allocation4 + $0x1], 0  ;;  %s494_s6 = smov 0   ;;  %s496_s7 = smov 0  }
   0x4   :  { %s498_s8 = smov 0   ;;  %s500_s9 = smov 0  }
   0x5 LB: > { %s515_s10 = sadd.s32 4294967295, %s478_s9   ;;  %s320_s11 = sadd.s32 4294967294, %s478_s9   ;;  %s478_s9 = sphi %s500_s9, %s688_s9   ;;  %s474_s8 = sphi %s498_s8, %s687_s8   ;;  %s470_s7 = sphi %s496_s7, %s686_s7   ;;  %s466_s6 = sphi %s494_s6, %s685_s6  }
   0x6   : > { %s519_s12 = sadd.s32 1, %s478_s9   ;;  %s24_s13 = sadd.s32 1, %s474_s8 }
   0x7   : > { %s21_s14 = ssub.s32 %s478_s9, %s519_s12  ;;  %p31_p0 = scmp.ne.s32.totalorder %s474_s8, %s470_s7 }
   0x8   : > { %p22_p1 = scmp.eq.s32.totalorder %s21_s14, 0  ;;  %p32_p2 = scmp.eq.s32.totalorder %s478_s9, 0 }
   0x9   : > { %p37_p3 = scmp.ne.s32.totalorder %s470_s7, %s466_s6  ;;  %p38_p4 = scmp.eq.s32.totalorder %s515_s10, 0 }
   0xa   : > { %s531_s15 = scalar_select %p22_p1, %s474_s8, %s24_s13  }
   0xb   : > { %p33_p5 = por %p32_p2, %p31_p0  ;;  %p533_p6 = por %p38_p4, %p37_p3 }
   0xc   : > { %p61_p7 = scmp.eq.s32.totalorder %s515_s10, 1  ;;  %p67_p8 = scmp.eq.s32.totalorder %s320_s11, 1 }
   0xd   : > { %s675_s16 = scalar_select %p533_p6, 1, 0 }
   0xe   : > { %p350_p10 = scmp.lt.s32.totalorder %s478_s9, 2  ;;  %p540_p11 = por %p61_p7, %p31_p0 }
   0xf   : > { %p544_p12 = por %p67_p8, %p37_p3  ;;  %s87_s19 = sand.u32 1, %s474_s8  }
  0x10   : > { %s676_s17 = scalar_select %p540_p11, 1, 0 }
  0x11   : > { %s677_s18 = scalar_select %p544_p12, 1, 0 }
  0x12   : > { %s329_s20 = smul.u32 384, %s478_s9  ;;  %p555_p13 = pnand %p350_p10, %p33_p5 }
  0x13   : > { %s328_s21 = smul.u32 24, %s87_s19  ;;  %s88_s28 = scalar_lea.sflag [#allocation3], %s87_s19 }
  0x14   : > { %s553_s24 = scalar_lea.hbm %s671_s0, %s329_s20  ;;  %p388_p3 = pneg %p555_p13 }
  0x15   : > { %s91_s26 = scalar_lea.vmem [#allocation2], %s328_s21  ;;  %s386_s29 = scalar_lea.hbm %s553_s24, 384 }
  0x16   : > { %s99_s27 = sshll.u32 %s91_s26, 4  ;;  %p387_p2 = scmp.ne.s32.totalorder %s553_s24, %s386_s29  ;;  %s100_s27 = int_to_ptr.vmem [resolvable:$true] %s99_s27 }
  0x17   : > { %s391_s3 = scalar_lea.hbm %s671_s0, 768  ;;  %p392_p5 = scmp.lt.s32.totalorder %s553_s24, %s671_s0 }
  0x18   : > { %p389_p4 = pnand %p388_p3, %p387_p2  ;;  %p393_p8 = scmp.lt.s32.totalorder %s391_s3, %s386_s29 }
  0x1a   : > { %p390_p7 = pneg %p389_p4  ;;  %p394_p10 = por %p393_p8, %p392_p5 }
  0x1c   : > { %p395_p9 = pnand %p394_p10, %p390_p7 }
  0x1e   : > { %398 = shalt.err (!%p395_p9)
}
  0x1f   : > { %s399_s11 = scalar_lea.vmem %s100_s27, 384  ;;  %s480_s13 = smov [#allocation2]  }
  0x20   : > { %p400_p0 = scmp.ne.s32.totalorder %s100_s27, %s399_s11  ;;  %s404_s14 = sshll.u32 %s480_s13, 4  ;;  %s405_s14 = int_to_ptr.vmem [resolvable:$false] %s404_s14 }
  0x21   : > { %s406_s19 = scalar_lea.vmem %s405_s14, 768  ;;  %p407_p2 = scmp.lt.s32.totalorder %s100_s27, %s405_s14 }
  0x22   : > { %p402_p1 = pnand %p400_p0, %p388_p3  ;;  %p408_p4 = scmp.lt.s32.totalorder %s406_s19, %s399_s11 }
  0x24   : > { %p403_p12 = pneg %p402_p1  ;;  %p409_p11 = por %p408_p4, %p407_p2 }
  0x26   : > { %p410_p6 = pnand %p409_p11, %p403_p12 }
  0x28   : > { %413 = shalt.err (!%p410_p6)
}
  0x29   : > { %345 = dma.hbm_to_vmem [thread:$0]  (!%p555_p13), %s553_s24, 384, %s100_s27, %s88_s28  }
  0x2a   : > { %p679_p9 = scmp.lt.s32.totalorder %s478_s9, 3  ;;  %p680_p7 = scmp.ge.s32.totalorder %s478_s9, 1 }
  0x2c   : > { %p105_p5 = pnand %p680_p7, %p679_p9 }
  0x2d   : > { %s580_s20 = sand.u32 (!%p105_p5), 1, %s470_s7   ;;  %p681_p6 = scmp.ne.s32.totalorder (!%p105_p5), %s675_s16, 0 }
  0x2e   : > { %108 = sbr.rel (%p105_p5) target bundleno = 193 (0xc1), region = 24  ;;  %s111_s22 = scalar_lea.sflag (!%p105_p5), [#allocation3], %s580_s20 }
  0x2f   : > { %s330_s21 = smul.u32 (!%p105_p5), 24, %s580_s20 }
  0x31   : > { %s114_s23 = scalar_lea.vmem (!%p105_p5), [#allocation2], %s330_s21 }
  0x33   : > { %457 = dma.done.wait (%p681_p6), %s111_s22, 384  }
  0x34   : > { %459 = vsyncadd (%p681_p6), %s111_s22, 4294966912  ;;  %v590_v0 = vld [vmem:[%s114_s23 + $0x10] sm:$0xff]  ;;  %v592_v1 = vld [vmem:[%s114_s23] sm:$0xff]  ;;  %s481_s24 = smov 127   ;;  %s482_s25 = smov 1   ;;  %v136_v3 = vlaneseq }
  0x35   : > { %192 = vrot.lane.b32.xlu1 %v590_v0, %s481_s24  ;;  %188 = vrot.lane.b32.xlu0 %v592_v1, %s481_s24  ;;  %v596_v2 = vld [vmem:[%s114_s23 + $0x8] sm:$0xff]  ;;  %s337_s16 = smul.u32 384, %s515_s10  ;;  %s132_s26 = scalar_lea.vmem [#allocation5], %s330_s21 }
  0x36   : > { %v137_v4 = vand.u32 127, %v136_v3  ;;  %s250_s27 = sshll.u32 %s132_s26, 4  ;;  %s236_s30 = scalar_lea.sflag [#allocation4], %s580_s20  ;;  %s626_s27 = int_to_ptr.vmem [resolvable:$true] %s250_s27 }
  0x37   : > { %s624_s29 = scalar_lea.hbm %s672_s1, %s337_s16  ;;  %s414_s2 = scalar_lea.vmem %s626_s27, 384 }
  0x38   : > { %v138_v5 = vadd.s32 128, %v137_v4  ;;  %v139_v6 = vadd.s32 256, %v137_v4  ;;  %v602_v7 = vmul.u32.u64.low 2863311531, %v137_v4  ;;  %v603_v8 = vmul.u32.u64.high 2863311531, %v137_v4, %v602_v7  ;;  %p415_p11 = scmp.ne.s32.totalorder %s626_s27, %s414_s2  ;;  %p682_p12 = scmp.ne.s32.totalorder %s676_s17, 0 }
  0x39   : > { %198 = vrot.lane.b32.xlu1 %v592_v1, %s482_s25  ;;  %190 = vrot.lane.b32.xlu0 %v596_v2, %s481_s24  ;;  %vm194_vm9 = vcmp.lt.s32.totalorder %v137_v4, 127  ;;  %vm204_vm10 = vcmp.lt.s32.totalorder %v137_v4, 1  ;;  %s483_s3 = smov [#allocation5]  }
  0x3a   : > { %v605_v9 = vmul.u32.u64.low 2863311531, %v138_v5  ;;  %v606_v10 = vmul.u32.u64.high 2863311531, %v138_v5, %v605_v9  ;;  %v608_v11 = vmul.u32.u64.low 2863311531, %v139_v6  ;;  %v609_v12 = vmul.u32.u64.high 2863311531, %v139_v6, %v608_v11  ;;  %p416_p13 = pnand %p415_p11, %p682_p12  ;;  %s418_s4 = sshll.u32 %s483_s3, 4  ;;  %s419_s4 = int_to_ptr.vmem [resolvable:$false] %s418_s4 }
  0x3b   : > { %v146_v13 = vshrl.u32 %v603_v8, 1  ;;  %s420_s5 = scalar_lea.vmem %s419_s4, 768  ;;  %p421_p1 = scmp.lt.s32.totalorder %s626_s27, %s419_s4 }
  0x3c   : > { %v157_v14 = vshrl.u32 %v606_v10, 1  ;;  %v168_v15 = vshrl.u32 %v609_v12, 1  ;;  %p417_p0 = pneg %p416_p13  ;;  %p422_p3 = scmp.lt.s32.totalorder %s420_s5, %s414_s2 }
  0x3d   : > { %202 = vrot.lane.b32.xlu1 %v590_v0, %s482_s25  ;;  %200 = vrot.lane.b32.xlu0 %v596_v2, %s482_s25  ;;  %v147_v16 = vmul.u32 3, %v146_v13 }
  0x3e   : > { %v158_v17 = vmul.u32 3, %v157_v14  ;;  %v169_v18 = vmul.u32 3, %v168_v15  ;;  %p423_p8 = por %p422_p3, %p421_p1 }
  0x3f   : > { %v148_v19 = vsub.s32 %v137_v4, %v147_v16 }
  0x40   : > { %v159_v20 = vsub.s32 %v138_v5, %v158_v17  ;;  %v170_v21 = vsub.s32 %v139_v6, %v169_v18  ;;  %p424_p10 = pnand %p423_p8, %p417_p0 }
  0x41   : > { %vm173_vm0 = vcmp.ne.s32.totalorder %v148_v19, 0  ;;  %vm176_vm1 = vcmp.lt.s32.totalorder %v148_v19, 0  ;;  %v182_v24 = vadd.s32 3, %v148_v19 }
  0x42   : > { %vm174_vm2 = vcmp.ne.s32.totalorder %v159_v20, 0  ;;  %vm177_vm3 = vcmp.lt.s32.totalorder %v159_v20, 0  ;;  %vm175_vm4 = vcmp.ne.s32.totalorder %v170_v21, 0  ;;  %vm178_vm5 = vcmp.lt.s32.totalorder %v170_v21, 0  ;;  %vm179_vm6 = vmand %vm176_vm1, %vm173_vm0 }
  0x43   : > { %vm180_vm7 = vmand %vm177_vm3, %vm174_vm2  ;;  %v183_v25 = vadd.s32 3, %v159_v20  ;;  %v184_v26 = vadd.s32 3, %v170_v21  ;;  %v185_v29 = vsel %vm179_vm6, %v182_v24, %v148_v19 }
  0x44   : > { %vm181_vm8 = vmand %vm178_vm5, %vm175_vm4  ;;  %vm208_vm11 = vcmp.eq.s32.totalorder %v185_v29, 1  ;;  %vm220_vm12 = vcmp.eq.s32.totalorder %v185_v29, 0 }
  0x45   : > { %v186_v30 = vsel %vm180_vm7, %v183_v25, %v159_v20  ;;  %v187_v31 = vsel %vm181_vm8, %v184_v26, %v170_v21 }
  0x46   : > { %vm209_vm13 = vcmp.eq.s32.totalorder %v186_v30, 1  ;;  %vm210_vm14 = vcmp.eq.s32.totalorder %v187_v31, 1  ;;  %vm221_vm15 = vcmp.eq.s32.totalorder %v186_v30, 0  ;;  %vm222_vm0 = vcmp.eq.s32.totalorder %v187_v31, 0 }
  0xa7   : > { %v193_v22 = vpop.permute.xlu1 %192  ;;  %v189_v23 = vpop.permute.xlu0 %188 }
  0xa8   : > { %v197_v32 = vsel %vm194_vm9, %v193_v22, %v189_v23 }
  0xab   : > { %v199_v27 = vpop.permute.xlu1 %198  ;;  %v191_v28 = vpop.permute.xlu0 %190 }
  0xac   : > { %v195_v33 = vsel %vm194_vm9, %v191_v28, %v193_v22  ;;  %v196_v36 = vsel %vm194_vm9, %v189_v23, %v191_v28 }
  0xaf   : > { %v203_v34 = vpop.permute.xlu1 %202  ;;  %v201_v35 = vpop.permute.xlu0 %200 }
  0xb0   : > { %v207_v37 = vsel %vm204_vm10, %v203_v34, %v199_v27  ;;  %v205_v38 = vsel %vm204_vm10, %v201_v35, %v203_v34  ;;  %v206_v39 = vsel %vm204_vm10, %v199_v27, %v201_v35 }
  0xb1   : > { %v217_v40 = vsel %vm208_vm11, %v196_v36, %v207_v37  ;;  %v218_v41 = vsel %vm209_vm13, %v195_v33, %v206_v39  ;;  %v219_v42 = vsel %vm210_vm14, %v197_v32, %v205_v38 }
  0xb2   : > { %v229_v43 = vsel %vm220_vm12, %v592_v1, %v217_v40  ;;  %v230_v44 = vsel %vm221_vm15, %v596_v2, %v218_v41  ;;  %v231_v45 = vsel %vm222_vm0, %v590_v0, %v219_v42 }
  0xb3   : > { %232 = vst [vmem:[%s132_s26] sm:$0xff] %v229_v43  ;;  %233 = vst [vmem:[%s132_s26 + $0x8] sm:$0xff] %v230_v44 }
  0xb4   : > { %234 = vst [vmem:[%s132_s26 + $0x10] sm:$0xff] %v231_v45 }
  0xb5   : > { %427 = shalt.err (!%p424_p10)
}
  0xb6   : > { %s428_s11 = scalar_lea.hbm %s624_s29, 384  ;;  %s432_s19 = scalar_lea.hbm %s672_s1, 768 }
  0xb7   : > { %p429_p2 = scmp.ne.s32.totalorder %s624_s29, %s428_s11  ;;  %p433_p7 = scmp.lt.s32.totalorder %s624_s29, %s672_s1 }
  0xb8   : > { %p434_p5 = scmp.lt.s32.totalorder %s432_s19, %s428_s11 }
  0xb9   : > { %p430_p4 = pnand %p429_p2, %p682_p12 }
  0xba   : > { %p435_p6 = por %p434_p5, %p433_p7 }
  0xbb   : > { %p431_p9 = pneg %p430_p4 }
  0xbd   : > { %p436_p11 = pnand %p435_p6, %p431_p9 }
  0xbf   : > { %439 = shalt.err (!%p436_p11)
}
  0xc0   : > { %340 = dma.vmem_to_hbm [thread:$0]  (%p682_p12), %s626_s27, 384, %s624_s29, %s236_s30  }
  0xc1 PF: > { %s262_s22 = sand.u32 1, %s466_s6   ;;  %p683_p13 = scmp.ne.s32.totalorder %s677_s18, 0 }
  0xc2   : > { %p684_p0 = scmp.ge.s32.totalorder %s478_s9, 2  ;;  %s263_s23 = scalar_lea.sflag [#allocation4], %s262_s22 }
  0xc4   : > { %p347_p1 = pnand %p684_p0, %p683_p13 }
  0xc6   : > { %p348_p3 = pneg %p347_p1 }
  0xc8   : > { %461 = dma.done.wait (%p348_p3), %s263_s23, 384  }
  0xc9   : > { %463 = vsyncadd (%p348_p3), %s263_s23, 4294966912  ;;  %p14_p8 = scmp.ge.s32.totalorder %s519_s12, 4   ;;  %s685_s6 = smov %s470_s7 }
  0xca   : > { %s686_s7 = smov %s474_s8  ;;  %s687_s8 = smov %s531_s15 }
  0xcb   : > { %s688_s9 = smov %s519_s12  ;;  %16 = sbr.rel (!%p14_p8) target bundleno = 5 (0x5), region = 69 }
  0xd0   :  { %268 = vsyncpa [#allocation3], 1 }
  0xd1   :  { %270 = vsyncpa [#allocation3 + $0x1], 1 }
  0xd2   :  { %271 = vsyncpa [#allocation4], 1 }
  0xd3   :  { %273 = vsyncpa [#allocation4 + $0x1], 1 }

</bundles_post_ra>
